<compile_context>
chip_gen: v5e
topology: v5e:2x2
jax: 0.10.0
libtpu: 0.0.40
codegen_flags: <defaults>
</compile_context>

<pallas_src>
import functools
from typing import NamedTuple, Optional

import jax
import jax.numpy as jnp
from jax.experimental import pallas as pl
from jax.experimental.pallas import tpu as pltpu


def _round_up(a, b):
    return (a + b - 1) // b * b


# ---------------------------------------------------------------------------
# In-kernel elementwise helpers (all math in f32).
# ---------------------------------------------------------------------------
def _k_sigmoid(x):
    # stable sigmoid: one exp(-|x|), divide via approx EUP reciprocal
    t = jnp.exp(-jnp.abs(x))
    r = pl.reciprocal(1.0 + t, approx=True)
    return jnp.where(x >= 0.0, r, t * r)


def _k_silu(x):
    return x * _k_sigmoid(x)


def _k_softplus(x):
    return jnp.maximum(x, 0.0) + jnp.log(1.0 + jnp.exp(-jnp.abs(x)))


def _k_sigmoid_and_softplus(x):
    # share the single exp(-|x|) between sigmoid(x) and softplus(x)
    t = jnp.exp(-jnp.abs(x))
    r = pl.reciprocal(1.0 + t, approx=True)
    sig = jnp.where(x >= 0.0, r, t * r)
    sp = jnp.maximum(x, 0.0) + jnp.log(1.0 + t)
    return sig, sp


class VAEOutput(NamedTuple):
    mu: Optional[jax.Array]          # z_dist mean
    scale: Optional[jax.Array]       # z_dist diagonal scale
    z_sample: Optional[jax.Array]
    x_recon: Optional[jax.Array]
    loss: Optional[jax.Array]
    loss_recon: Optional[jax.Array]
    loss_kl: Optional[jax.Array]


# ---------------------------------------------------------------------------
# Fused VAE forward kernel (one batch tile per grid step).
# ---------------------------------------------------------------------------
def _vae_fused_kernel(eps, n_hid_enc, n_dec, latent_dim, input_dim,
                      pack_width, loss_only, matmul_dtype,
                      x_ref, noise_ref, *refs):
    # params: [enc hidden (w,b)]*n_hid_enc, mu head (w,b), logvar head (w,b),
    #         [dec (w,b)]*n_dec  — then the single packed output ref.
    n_params = 2 * n_hid_enc + 4 + 2 * n_dec
    p = refs[:n_params]
    out_ref = refs[n_params]

    xf = x_ref[...].astype(jnp.float32)

    def linear(a, w_ref, b_ref):
        # bf16 operands -> MXU, f32 accumulate; bias added in f32.
        return (jnp.dot(a.astype(matmul_dtype), w_ref[...],
                        preferred_element_type=jnp.float32)
                + b_ref[...].astype(jnp.float32))

    # ---- encoder trunk ----
    h = xf
    idx = 0
    for _ in range(n_hid_enc):
        h = _k_silu(linear(h, p[idx], p[idx + 1]))
        idx += 2
    # lane-aligned mu / logvar heads (instead of slicing a 2*latent vector)
    mu = linear(h, p[idx], p[idx + 1]); idx += 2
    logvar = linear(h, p[idx], p[idx + 1]); idx += 2

    scale = _k_softplus(logvar) + eps

    # ---- reparameterize ----
    z = mu + scale * noise_ref[...].astype(jnp.float32)

    # ---- decoder (last layer kept as logits) ----
    d = z
    for i in range(n_dec):
        d = linear(d, p[idx], p[idx + 1]); idx += 2
        if i < n_dec - 1:
            d = _k_silu(d)

    # ---- per-row loss partials ----
    # BCE with logits: softplus(d) - x*d  ==  -(x log s + (1-x) log(1-s)),
    # s = sigmoid(d).  No log/clamp on the wide tensor.
    if loss_only:
        sp = _k_softplus(d)
        x_recon = None
    else:
        x_recon, sp = _k_sigmoid_and_softplus(d)
    nll = jnp.sum(sp - xf * d, axis=-1, keepdims=True)
    kl = (0.5 * jnp.sum(scale * scale + mu * mu - 1.0, axis=-1, keepdims=True)
          - jnp.sum(jnp.log(scale), axis=-1, keepdims=True))

    # ---- single lane-dense packed store ----
    bt = xf.shape[0]
    if loss_only:
        pieces = [nll, kl]
        used = 2
    else:
        pieces = [x_recon, mu, scale, z, nll, kl]
        used = input_dim + 3 * latent_dim + 2
    pad_w = pack_width - used
    if pad_w > 0:
        pieces.append(jnp.zeros((bt, pad_w), jnp.float32))
    out_ref[...] = jnp.concatenate(pieces, axis=-1).astype(out_ref.dtype)


# ---------------------------------------------------------------------------
# Wrapper
# ---------------------------------------------------------------------------
def vae_forward(x, params, noise, *, eps=1e-8, compute_loss=True,
                loss_only=False, batch_tile=512,
                matmul_dtype=jnp.bfloat16, pack_dtype=jnp.float32):
    """Fused VAE forward.

    batch_tile is the primary tuning knob (sweep 256/512/1024/2048).  For this
    model size VMEM is never the limit; if hidden_dim grows (>=1024), re-derive
    the VMEM budget for v7x (64 MiB) and consider vmem_limit_bytes /
    pl.Buffered(1) on the resident weight specs.
    """
    if loss_only:
        assert compute_loss, "loss_only=True requires compute_loss=True"

    enc_w, enc_b = params["enc_w"], params["enc_b"]
    dec_w, dec_b = params["dec_w"], params["dec_b"]
    n_enc, n_dec = len(enc_w), len(dec_w)
    n_hid_enc = n_enc - 1
    input_dim = enc_w[0].shape[0]
    latent_dim = dec_w[0].shape[0]

    # No dtype cast and no padding copy of x here (would be an extra un-hidden
    # HBM pass); the kernel reads x as-is and casts in VMEM.
    xr = x.reshape(-1, input_dim)
    B = xr.shape[0]
    assert noise.shape == (B, latent_dim), (noise.shape, (B, latent_dim))

    # batch tile: multiple of 8 (sublane); ragged last block handled by Pallas.
    bt = int(min(batch_tile, _round_up(B, 8)))
    bt = _round_up(bt, 8)
    grid = (pl.cdiv(B, bt),)

    # split the final encoder Linear into lane-aligned mu / logvar heads
    head_w, head_b = enc_w[-1], enc_b[-1]
    mu_w, lv_w = head_w[:, :latent_dim], head_w[:, latent_dim:]
    mu_b, lv_b = head_b[:, :latent_dim], head_b[:, latent_dim:]

    wd = matmul_dtype
    flat_params = []
    for w, b in zip(enc_w[:-1], enc_b[:-1]):
        flat_params += [w.astype(wd), b.astype(jnp.float32)]
    flat_params += [mu_w.astype(wd), mu_b.astype(jnp.float32),
                    lv_w.astype(wd), lv_b.astype(jnp.float32)]
    for w, b in zip(dec_w, dec_b):
        flat_params += [w.astype(wd), b.astype(jnp.float32)]

    if loss_only:
        pack_width = 8                          # [nll | kl | pad6]
    else:
        pack_width = _round_up(input_dim + 3 * latent_dim + 2, 128)

    # weights/biases: full-block, grid-invariant (VMEM resident across steps);
    # all params are 2-D.
    def resident(arr):
        return pl.BlockSpec(arr.shape, lambda i: (0, 0))

    in_specs = [
        pl.BlockSpec((bt, input_dim), lambda i: (i, 0)),      # x tile
        pl.BlockSpec((bt, latent_dim), lambda i: (i, 0)),     # noise tile
    ] + [resident(a) for a in flat_params]

    out_shape = jax.ShapeDtypeStruct((B, pack_width), pack_dtype)
    out_specs = pl.BlockSpec((bt, pack_width), lambda i: (i, 0))

    kernel = functools.partial(
        _vae_fused_kernel, float(eps), n_hid_enc, n_dec, latent_dim,
        input_dim, pack_width, loss_only, matmul_dtype)

    packed = pl.pallas_call(
        kernel,
        out_shape=out_shape,
        grid=grid,
        in_specs=in_specs,
        out_specs=out_specs,
        compiler_params=pltpu.CompilerParams(
            dimension_semantics=("parallel",),   # shards batch tiles on v7x
        ),
    )(xr, noise, *flat_params)

    if loss_only:
        loss_recon = jnp.mean(packed[:, 0].astype(jnp.float32))
        loss_kl = jnp.mean(packed[:, 1].astype(jnp.float32))
        return VAEOutput(mu=None, scale=None, z_sample=None, x_recon=None,
                         loss=loss_recon + loss_kl, loss_recon=loss_recon,
                         loss_kl=loss_kl)

    o = 0
    x_recon = packed[:, o:o + input_dim]; o += input_dim
    mu = packed[:, o:o + latent_dim]; o += latent_dim
    scale = packed[:, o:o + latent_dim]; o += latent_dim
    z = packed[:, o:o + latent_dim]; o += latent_dim
    nll = packed[:, o]; o += 1
    kl = packed[:, o]

    loss = loss_recon = loss_kl = None
    if compute_loss:
        loss_recon = jnp.mean(nll.astype(jnp.float32))
        loss_kl = jnp.mean(kl.astype(jnp.float32))
        loss = loss_recon + loss_kl

    return VAEOutput(mu=mu, scale=scale, z_sample=z, x_recon=x_recon,
                     loss=loss, loss_recon=loss_recon, loss_kl=loss_kl)


# ---------------------------------------------------------------------------
# Parameter init (PyTorch-style uniform(-1/sqrt(fan_in), 1/sqrt(fan_in)))
# ---------------------------------------------------------------------------
def init_params(key, input_dim, hidden_dim, latent_dim):
    enc_dims = [input_dim, hidden_dim, hidden_dim // 2, hidden_dim // 4,
                hidden_dim // 8, 2 * latent_dim]
    dec_dims = [latent_dim, hidden_dim // 8, hidden_dim // 4, hidden_dim // 2,
                hidden_dim, input_dim]

    def make(key, dims):
        ws, bs = [], []
        for i in range(len(dims) - 1):
            key, kw, kb = jax.random.split(key, 3)
            bound = 1.0 / (dims[i] ** 0.5)
            ws.append(jax.random.uniform(kw, (dims[i], dims[i + 1]),
                                         jnp.float32, -bound, bound))
            bs.append(jax.random.uniform(kb, (1, dims[i + 1]),
                                         jnp.float32, -bound, bound))
        return ws, bs, key

    enc_w, enc_b, key = make(key, enc_dims)
    dec_w, dec_b, key = make(key, dec_dims)
    return {"enc_w": enc_w, "enc_b": enc_b, "dec_w": dec_w, "dec_b": dec_b}


# ---------------------------------------------------------------------------
# Pure-JAX reference of the PyTorch forward (f32, matches torch math)
# ---------------------------------------------------------------------------
def ref_forward(x, params, noise, eps=1e-8):
    input_dim = params["enc_w"][0].shape[0]
    xf = x.reshape(-1, input_dim).astype(jnp.float32)

    h = xf
    n_enc = len(params["enc_w"])
    for i in range(n_enc):
        h = h @ params["enc_w"][i] + params["enc_b"][i]
        if i < n_enc - 1:
            h = jax.nn.silu(h)
    latent = h.shape[-1] // 2
    mu, logvar = h[:, :latent], h[:, latent:]
    scale = jax.nn.softplus(logvar) + eps
    z = mu + scale * noise.astype(jnp.float32)

    d = z
    n_dec = len(params["dec_w"])
    for i in range(n_dec):
        d = d @ params["dec_w"][i] + params["dec_b"][i]
        if i < n_dec - 1:
            d = jax.nn.silu(d)
    x_recon = jax.nn.sigmoid(d)

    # PyTorch BCE clamps log terms at -100
    log_r = jnp.maximum(jnp.log(x_recon), -100.0)
    log_1mr = jnp.maximum(jnp.log(1.0 - x_recon), -100.0)
    bce = -(xf * log_r + (1.0 - xf) * log_1mr)
    loss_recon = jnp.mean(jnp.sum(bce, axis=-1))
    kl = (0.5 * jnp.sum(scale * scale + mu * mu - 1.0, axis=-1)
          - jnp.sum(jnp.log(scale), axis=-1))
    loss_kl = jnp.mean(kl)
    return dict(mu=mu, scale=scale, z=z, x_recon=x_recon,
                loss=loss_recon + loss_kl, loss_recon=loss_recon,
                loss_kl=loss_kl)


if __name__ == "__main__":
    key = jax.random.PRNGKey(0)
    input_dim, hidden_dim, latent_dim = 64, 64, 8
    # x: (batch=2, channels=4, features=64) -> reshape(-1, 64) gives 8 rows
    N, C = 2, 4

    k_x, k_noise, k_params = jax.random.split(key, 3)
    x = jax.random.uniform(k_x, (N, C, input_dim), dtype=jnp.float32)  # in [0,1]
    params = init_params(k_params, input_dim, hidden_dim, latent_dim)
    B_flat = x.size // input_dim
    noise = jax.random.normal(k_noise, (B_flat, latent_dim), dtype=jnp.float32)

    out = jax.block_until_ready(vae_forward(x, params, noise))
    ref = ref_forward(x, params, noise)

    def close(a, b):
        return bool(jnp.allclose(jnp.asarray(a, jnp.float32),
                                 jnp.asarray(b, jnp.float32),
                                 rtol=2e-2, atol=2e-2))

    assert out.x_recon.shape == (B_flat, input_dim), out.x_recon.shape
    assert out.z_sample.shape == (B_flat, latent_dim), out.z_sample.shape
    assert close(out.mu, ref["mu"]), "mu mismatch"
    assert close(out.scale, ref["scale"]), "scale mismatch"
    assert close(out.z_sample, ref["z"]), "z mismatch"
    assert close(out.x_recon, ref["x_recon"]), "x_recon mismatch"
    assert close(out.loss_recon, ref["loss_recon"]), "loss_recon mismatch"
    assert close(out.loss_kl, ref["loss_kl"]), "loss_kl mismatch"
    assert close(out.loss, ref["loss"]), "loss mismatch"

    # loss-only (training-step) path: skips the large HBM writes entirely
    out_lo = jax.block_until_ready(vae_forward(x, params, noise, loss_only=True))
    assert close(out_lo.loss_recon, ref["loss_recon"]), "loss_only recon mismatch"
    assert close(out_lo.loss_kl, ref["loss_kl"]), "loss_only kl mismatch"
    assert close(out_lo.loss, ref["loss"]), "loss_only loss mismatch"

    print("KERNEL_OK")
</pallas_src>

<mosaic_0001>
module attributes {stable_mosaic.version = 11 : i64} {
  func.func @_vae_fused_kernel(%arg0: i32, %arg1: memref<8x64xf32, #tpu.memory_space<vmem>>, %arg2: memref<8x8xf32, #tpu.memory_space<vmem>>, %arg3: memref<64x64xbf16, #tpu.memory_space<vmem>>, %arg4: memref<1x64xf32, #tpu.memory_space<vmem>>, %arg5: memref<64x32xbf16, #tpu.memory_space<vmem>>, %arg6: memref<1x32xf32, #tpu.memory_space<vmem>>, %arg7: memref<32x16xbf16, #tpu.memory_space<vmem>>, %arg8: memref<1x16xf32, #tpu.memory_space<vmem>>, %arg9: memref<16x8xbf16, #tpu.memory_space<vmem>>, %arg10: memref<1x8xf32, #tpu.memory_space<vmem>>, %arg11: memref<8x8xbf16, #tpu.memory_space<vmem>>, %arg12: memref<1x8xf32, #tpu.memory_space<vmem>>, %arg13: memref<8x8xbf16, #tpu.memory_space<vmem>>, %arg14: memref<1x8xf32, #tpu.memory_space<vmem>>, %arg15: memref<8x8xbf16, #tpu.memory_space<vmem>>, %arg16: memref<1x8xf32, #tpu.memory_space<vmem>>, %arg17: memref<8x16xbf16, #tpu.memory_space<vmem>>, %arg18: memref<1x16xf32, #tpu.memory_space<vmem>>, %arg19: memref<16x32xbf16, #tpu.memory_space<vmem>>, %arg20: memref<1x32xf32, #tpu.memory_space<vmem>>, %arg21: memref<32x64xbf16, #tpu.memory_space<vmem>>, %arg22: memref<1x64xf32, #tpu.memory_space<vmem>>, %arg23: memref<64x64xbf16, #tpu.memory_space<vmem>>, %arg24: memref<1x64xf32, #tpu.memory_space<vmem>>, %arg25: memref<8x128xf32, #tpu.memory_space<vmem>>) attributes {dimension_semantics = [#tpu.dimension_semantics<parallel>], iteration_bounds = array<i64: 1>, scalar_prefetch = 0 : i64, scratch_operands = 0 : i64, tpu.core_type = #tpu.core_type<tc>, window_params = [{transform_indices = @transform_0, window_bounds = array<i64: 8, 64>}, {transform_indices = @transform_1, window_bounds = array<i64: 8, 8>}, {pipeline_mode = #tpu.pipeline_mode<synchronous>, transform_indices = @transform_2, window_bounds = array<i64: 64, 64>}, {pipeline_mode = #tpu.pipeline_mode<synchronous>, transform_indices = @transform_3, window_bounds = array<i64: 1, 64>}, {pipeline_mode = #tpu.pipeline_mode<synchronous>, transform_indices = @transform_4, window_bounds = array<i64: 64, 32>}, {pipeline_mode = #tpu.pipeline_mode<synchronous>, transform_indices = @transform_5, window_bounds = array<i64: 1, 32>}, {pipeline_mode = #tpu.pipeline_mode<synchronous>, transform_indices = @transform_6, window_bounds = array<i64: 32, 16>}, {pipeline_mode = #tpu.pipeline_mode<synchronous>, transform_indices = @transform_7, window_bounds = array<i64: 1, 16>}, {pipeline_mode = #tpu.pipeline_mode<synchronous>, transform_indices = @transform_8, window_bounds = array<i64: 16, 8>}, {pipeline_mode = #tpu.pipeline_mode<synchronous>, transform_indices = @transform_9, window_bounds = array<i64: 1, 8>}, {pipeline_mode = #tpu.pipeline_mode<synchronous>, transform_indices = @transform_10, window_bounds = array<i64: 8, 8>}, {pipeline_mode = #tpu.pipeline_mode<synchronous>, transform_indices = @transform_11, window_bounds = array<i64: 1, 8>}, {pipeline_mode = #tpu.pipeline_mode<synchronous>, transform_indices = @transform_12, window_bounds = array<i64: 8, 8>}, {pipeline_mode = #tpu.pipeline_mode<synchronous>, transform_indices = @transform_13, window_bounds = array<i64: 1, 8>}, {pipeline_mode = #tpu.pipeline_mode<synchronous>, transform_indices = @transform_14, window_bounds = array<i64: 8, 8>}, {pipeline_mode = #tpu.pipeline_mode<synchronous>, transform_indices = @transform_15, window_bounds = array<i64: 1, 8>}, {pipeline_mode = #tpu.pipeline_mode<synchronous>, transform_indices = @transform_16, window_bounds = array<i64: 8, 16>}, {pipeline_mode = #tpu.pipeline_mode<synchronous>, transform_indices = @transform_17, window_bounds = array<i64: 1, 16>}, {pipeline_mode = #tpu.pipeline_mode<synchronous>, transform_indices = @transform_18, window_bounds = array<i64: 16, 32>}, {pipeline_mode = #tpu.pipeline_mode<synchronous>, transform_indices = @transform_19, window_bounds = array<i64: 1, 32>}, {pipeline_mode = #tpu.pipeline_mode<synchronous>, transform_indices = @transform_20, window_bounds = array<i64: 32, 64>}, {pipeline_mode = #tpu.pipeline_mode<synchronous>, transform_indices = @transform_21, window_bounds = array<i64: 1, 64>}, {pipeline_mode = #tpu.pipeline_mode<synchronous>, transform_indices = @transform_22, window_bounds = array<i64: 64, 64>}, {pipeline_mode = #tpu.pipeline_mode<synchronous>, transform_indices = @transform_23, window_bounds = array<i64: 1, 64>}, {transform_indices = @transform_24, window_bounds = array<i64: 8, 128>}]} {
    %c0 = arith.constant 0 : index
    %c0_0 = arith.constant 0 : index
    %0 = vector.load %arg1[%c0, %c0_0] : memref<8x64xf32, #tpu.memory_space<vmem>>, vector<8x64xf32>
    %1 = arith.truncf %0 : vector<8x64xf32> to vector<8x64xbf16>
    %c0_1 = arith.constant 0 : index
    %c0_2 = arith.constant 0 : index
    %2 = vector.load %arg3[%c0_1, %c0_2] : memref<64x64xbf16, #tpu.memory_space<vmem>>, vector<64x64xbf16>
    %cst = arith.constant dense<0.000000e+00> : vector<8x64xf32>
    %3 = tpu.matmul %1, %2, %cst {dimension_numbers = #tpu.dot_dimension_numbers<[1], [0], [0], [1], [0, 0, 1, 1], [], []>} : vector<8x64xbf16>, vector<64x64xbf16>, vector<8x64xf32> -> vector<8x64xf32>
    %c0_3 = arith.constant 0 : index
    %c0_4 = arith.constant 0 : index
    %4 = vector.load %arg4[%c0_3, %c0_4] : memref<1x64xf32, #tpu.memory_space<vmem>>, vector<1x64xf32>
    %5 = vector.broadcast %4 : vector<1x64xf32> to vector<8x64xf32>
    %6 = arith.addf %3, %5 : vector<8x64xf32>
    %7 = math.absf %6 : vector<8x64xf32>
    %cst_5 = arith.constant 0.000000e+00 : f32
    %8 = vector.broadcast %cst_5 : f32 to vector<8x64xf32>
    %9 = arith.subf %8, %7 : vector<8x64xf32>
    %10 = math.exp %9 : vector<8x64xf32>
    %cst_6 = arith.constant 1.000000e+00 : f32
    %11 = vector.broadcast %cst_6 : f32 to vector<8x64xf32>
    %12 = arith.addf %11, %10 : vector<8x64xf32>
    %13 = tpu.reciprocal %12 {approx = true} : vector<8x64xf32> -> vector<8x64xf32>
    %cst_7 = arith.constant 0.000000e+00 : f32
    %14 = vector.broadcast %cst_7 : f32 to vector<8x64xf32>
    %15 = arith.cmpf oge, %6, %14 : vector<8x64xf32>
    %16 = arith.mulf %10, %13 : vector<8x64xf32>
    %17 = arith.select %15, %13, %16 : vector<8x64xi1>, vector<8x64xf32>
    %18 = arith.mulf %6, %17 : vector<8x64xf32>
    %19 = arith.truncf %18 : vector<8x64xf32> to vector<8x64xbf16>
    %c0_8 = arith.constant 0 : index
    %c0_9 = arith.constant 0 : index
    %20 = vector.load %arg5[%c0_8, %c0_9] : memref<64x32xbf16, #tpu.memory_space<vmem>>, vector<64x32xbf16>
    %cst_10 = arith.constant dense<0.000000e+00> : vector<8x32xf32>
    %21 = tpu.matmul %19, %20, %cst_10 {dimension_numbers = #tpu.dot_dimension_numbers<[1], [0], [0], [1], [0, 0, 1, 1], [], []>} : vector<8x64xbf16>, vector<64x32xbf16>, vector<8x32xf32> -> vector<8x32xf32>
    %c0_11 = arith.constant 0 : index
    %c0_12 = arith.constant 0 : index
    %22 = vector.load %arg6[%c0_11, %c0_12] : memref<1x32xf32, #tpu.memory_space<vmem>>, vector<1x32xf32>
    %23 = vector.broadcast %22 : vector<1x32xf32> to vector<8x32xf32>
    %24 = arith.addf %21, %23 : vector<8x32xf32>
    %25 = math.absf %24 : vector<8x32xf32>
    %cst_13 = arith.constant 0.000000e+00 : f32
    %26 = vector.broadcast %cst_13 : f32 to vector<8x32xf32>
    %27 = arith.subf %26, %25 : vector<8x32xf32>
    %28 = math.exp %27 : vector<8x32xf32>
    %cst_14 = arith.constant 1.000000e+00 : f32
    %29 = vector.broadcast %cst_14 : f32 to vector<8x32xf32>
    %30 = arith.addf %29, %28 : vector<8x32xf32>
    %31 = tpu.reciprocal %30 {approx = true} : vector<8x32xf32> -> vector<8x32xf32>
    %cst_15 = arith.constant 0.000000e+00 : f32
    %32 = vector.broadcast %cst_15 : f32 to vector<8x32xf32>
    %33 = arith.cmpf oge, %24, %32 : vector<8x32xf32>
    %34 = arith.mulf %28, %31 : vector<8x32xf32>
    %35 = arith.select %33, %31, %34 : vector<8x32xi1>, vector<8x32xf32>
    %36 = arith.mulf %24, %35 : vector<8x32xf32>
    %37 = arith.truncf %36 : vector<8x32xf32> to vector<8x32xbf16>
    %c0_16 = arith.constant 0 : index
    %c0_17 = arith.constant 0 : index
    %38 = vector.load %arg7[%c0_16, %c0_17] : memref<32x16xbf16, #tpu.memory_space<vmem>>, vector<32x16xbf16>
    %cst_18 = arith.constant dense<0.000000e+00> : vector<8x16xf32>
    %39 = tpu.matmul %37, %38, %cst_18 {dimension_numbers = #tpu.dot_dimension_numbers<[1], [0], [0], [1], [0, 0, 1, 1], [], []>} : vector<8x32xbf16>, vector<32x16xbf16>, vector<8x16xf32> -> vector<8x16xf32>
    %c0_19 = arith.constant 0 : index
    %c0_20 = arith.constant 0 : index
    %40 = vector.load %arg8[%c0_19, %c0_20] : memref<1x16xf32, #tpu.memory_space<vmem>>, vector<1x16xf32>
    %41 = vector.broadcast %40 : vector<1x16xf32> to vector<8x16xf32>
    %42 = arith.addf %39, %41 : vector<8x16xf32>
    %43 = math.absf %42 : vector<8x16xf32>
    %cst_21 = arith.constant 0.000000e+00 : f32
    %44 = vector.broadcast %cst_21 : f32 to vector<8x16xf32>
    %45 = arith.subf %44, %43 : vector<8x16xf32>
    %46 = math.exp %45 : vector<8x16xf32>
    %cst_22 = arith.constant 1.000000e+00 : f32
    %47 = vector.broadcast %cst_22 : f32 to vector<8x16xf32>
    %48 = arith.addf %47, %46 : vector<8x16xf32>
    %49 = tpu.reciprocal %48 {approx = true} : vector<8x16xf32> -> vector<8x16xf32>
    %cst_23 = arith.constant 0.000000e+00 : f32
    %50 = vector.broadcast %cst_23 : f32 to vector<8x16xf32>
    %51 = arith.cmpf oge, %42, %50 : vector<8x16xf32>
    %52 = arith.mulf %46, %49 : vector<8x16xf32>
    %53 = arith.select %51, %49, %52 : vector<8x16xi1>, vector<8x16xf32>
    %54 = arith.mulf %42, %53 : vector<8x16xf32>
    %55 = arith.truncf %54 : vector<8x16xf32> to vector<8x16xbf16>
    %c0_24 = arith.constant 0 : index
    %c0_25 = arith.constant 0 : index
    %56 = vector.load %arg9[%c0_24, %c0_25] : memref<16x8xbf16, #tpu.memory_space<vmem>>, vector<16x8xbf16>
    %cst_26 = arith.constant dense<0.000000e+00> : vector<8x8xf32>
    %57 = tpu.matmul %55, %56, %cst_26 {dimension_numbers = #tpu.dot_dimension_numbers<[1], [0], [0], [1], [0, 0, 1, 1], [], []>} : vector<8x16xbf16>, vector<16x8xbf16>, vector<8x8xf32> -> vector<8x8xf32>
    %c0_27 = arith.constant 0 : index
    %c0_28 = arith.constant 0 : index
    %58 = vector.load %arg10[%c0_27, %c0_28] : memref<1x8xf32, #tpu.memory_space<vmem>>, vector<1x8xf32>
    %59 = vector.broadcast %58 : vector<1x8xf32> to vector<8x8xf32>
    %60 = arith.addf %57, %59 : vector<8x8xf32>
    %61 = math.absf %60 : vector<8x8xf32>
    %cst_29 = arith.constant 0.000000e+00 : f32
    %62 = vector.broadcast %cst_29 : f32 to vector<8x8xf32>
    %63 = arith.subf %62, %61 : vector<8x8xf32>
    %64 = math.exp %63 : vector<8x8xf32>
    %cst_30 = arith.constant 1.000000e+00 : f32
    %65 = vector.broadcast %cst_30 : f32 to vector<8x8xf32>
    %66 = arith.addf %65, %64 : vector<8x8xf32>
    %67 = tpu.reciprocal %66 {approx = true} : vector<8x8xf32> -> vector<8x8xf32>
    %cst_31 = arith.constant 0.000000e+00 : f32
    %68 = vector.broadcast %cst_31 : f32 to vector<8x8xf32>
    %69 = arith.cmpf oge, %60, %68 : vector<8x8xf32>
    %70 = arith.mulf %64, %67 : vector<8x8xf32>
    %71 = arith.select %69, %67, %70 : vector<8x8xi1>, vector<8x8xf32>
    %72 = arith.mulf %60, %71 : vector<8x8xf32>
    %73 = arith.truncf %72 : vector<8x8xf32> to vector<8x8xbf16>
    %c0_32 = arith.constant 0 : index
    %c0_33 = arith.constant 0 : index
    %74 = vector.load %arg11[%c0_32, %c0_33] : memref<8x8xbf16, #tpu.memory_space<vmem>>, vector<8x8xbf16>
    %cst_34 = arith.constant dense<0.000000e+00> : vector<8x8xf32>
    %75 = tpu.matmul %73, %74, %cst_34 {dimension_numbers = #tpu.dot_dimension_numbers<[1], [0], [0], [1], [0, 0, 1, 1], [], []>} : vector<8x8xbf16>, vector<8x8xbf16>, vector<8x8xf32> -> vector<8x8xf32>
    %c0_35 = arith.constant 0 : index
    %c0_36 = arith.constant 0 : index
    %76 = vector.load %arg12[%c0_35, %c0_36] : memref<1x8xf32, #tpu.memory_space<vmem>>, vector<1x8xf32>
    %77 = vector.broadcast %76 : vector<1x8xf32> to vector<8x8xf32>
    %78 = arith.addf %75, %77 : vector<8x8xf32>
    %79 = arith.truncf %72 : vector<8x8xf32> to vector<8x8xbf16>
    %c0_37 = arith.constant 0 : index
    %c0_38 = arith.constant 0 : index
    %80 = vector.load %arg13[%c0_37, %c0_38] : memref<8x8xbf16, #tpu.memory_space<vmem>>, vector<8x8xbf16>
    %cst_39 = arith.constant dense<0.000000e+00> : vector<8x8xf32>
    %81 = tpu.matmul %79, %80, %cst_39 {dimension_numbers = #tpu.dot_dimension_numbers<[1], [0], [0], [1], [0, 0, 1, 1], [], []>} : vector<8x8xbf16>, vector<8x8xbf16>, vector<8x8xf32> -> vector<8x8xf32>
    %c0_40 = arith.constant 0 : index
    %c0_41 = arith.constant 0 : index
    %82 = vector.load %arg14[%c0_40, %c0_41] : memref<1x8xf32, #tpu.memory_space<vmem>>, vector<1x8xf32>
    %83 = vector.broadcast %82 : vector<1x8xf32> to vector<8x8xf32>
    %84 = arith.addf %81, %83 : vector<8x8xf32>
    %cst_42 = arith.constant 0.000000e+00 : f32
    %85 = vector.broadcast %cst_42 : f32 to vector<8x8xf32>
    %86 = arith.maximumf %84, %85 : vector<8x8xf32>
    %87 = math.absf %84 : vector<8x8xf32>
    %cst_43 = arith.constant 0.000000e+00 : f32
    %88 = vector.broadcast %cst_43 : f32 to vector<8x8xf32>
    %89 = arith.subf %88, %87 : vector<8x8xf32>
    %90 = math.exp %89 : vector<8x8xf32>
    %cst_44 = arith.constant 1.000000e+00 : f32
    %91 = vector.broadcast %cst_44 : f32 to vector<8x8xf32>
    %92 = arith.addf %91, %90 : vector<8x8xf32>
    %93 = math.log %92 : vector<8x8xf32>
    %94 = arith.addf %86, %93 : vector<8x8xf32>
    %cst_45 = arith.constant 9.99999993E-9 : f32
    %95 = vector.broadcast %cst_45 : f32 to vector<8x8xf32>
    %96 = arith.addf %94, %95 : vector<8x8xf32>
    %c0_46 = arith.constant 0 : index
    %c0_47 = arith.constant 0 : index
    %97 = vector.load %arg2[%c0_46, %c0_47] : memref<8x8xf32, #tpu.memory_space<vmem>>, vector<8x8xf32>
    %98 = arith.mulf %96, %97 : vector<8x8xf32>
    %99 = arith.addf %78, %98 : vector<8x8xf32>
    %100 = arith.truncf %99 : vector<8x8xf32> to vector<8x8xbf16>
    %c0_48 = arith.constant 0 : index
    %c0_49 = arith.constant 0 : index
    %101 = vector.load %arg15[%c0_48, %c0_49] : memref<8x8xbf16, #tpu.memory_space<vmem>>, vector<8x8xbf16>
    %cst_50 = arith.constant dense<0.000000e+00> : vector<8x8xf32>
    %102 = tpu.matmul %100, %101, %cst_50 {dimension_numbers = #tpu.dot_dimension_numbers<[1], [0], [0], [1], [0, 0, 1, 1], [], []>} : vector<8x8xbf16>, vector<8x8xbf16>, vector<8x8xf32> -> vector<8x8xf32>
    %c0_51 = arith.constant 0 : index
    %c0_52 = arith.constant 0 : index
    %103 = vector.load %arg16[%c0_51, %c0_52] : memref<1x8xf32, #tpu.memory_space<vmem>>, vector<1x8xf32>
    %104 = vector.broadcast %103 : vector<1x8xf32> to vector<8x8xf32>
    %105 = arith.addf %102, %104 : vector<8x8xf32>
    %106 = math.absf %105 : vector<8x8xf32>
    %cst_53 = arith.constant 0.000000e+00 : f32
    %107 = vector.broadcast %cst_53 : f32 to vector<8x8xf32>
    %108 = arith.subf %107, %106 : vector<8x8xf32>
    %109 = math.exp %108 : vector<8x8xf32>
    %cst_54 = arith.constant 1.000000e+00 : f32
    %110 = vector.broadcast %cst_54 : f32 to vector<8x8xf32>
    %111 = arith.addf %110, %109 : vector<8x8xf32>
    %112 = tpu.reciprocal %111 {approx = true} : vector<8x8xf32> -> vector<8x8xf32>
    %cst_55 = arith.constant 0.000000e+00 : f32
    %113 = vector.broadcast %cst_55 : f32 to vector<8x8xf32>
    %114 = arith.cmpf oge, %105, %113 : vector<8x8xf32>
    %115 = arith.mulf %109, %112 : vector<8x8xf32>
    %116 = arith.select %114, %112, %115 : vector<8x8xi1>, vector<8x8xf32>
    %117 = arith.mulf %105, %116 : vector<8x8xf32>
    %118 = arith.truncf %117 : vector<8x8xf32> to vector<8x8xbf16>
    %c0_56 = arith.constant 0 : index
    %c0_57 = arith.constant 0 : index
    %119 = vector.load %arg17[%c0_56, %c0_57] : memref<8x16xbf16, #tpu.memory_space<vmem>>, vector<8x16xbf16>
    %cst_58 = arith.constant dense<0.000000e+00> : vector<8x16xf32>
    %120 = tpu.matmul %118, %119, %cst_58 {dimension_numbers = #tpu.dot_dimension_numbers<[1], [0], [0], [1], [0, 0, 1, 1], [], []>} : vector<8x8xbf16>, vector<8x16xbf16>, vector<8x16xf32> -> vector<8x16xf32>
    %c0_59 = arith.constant 0 : index
    %c0_60 = arith.constant 0 : index
    %121 = vector.load %arg18[%c0_59, %c0_60] : memref<1x16xf32, #tpu.memory_space<vmem>>, vector<1x16xf32>
    %122 = vector.broadcast %121 : vector<1x16xf32> to vector<8x16xf32>
    %123 = arith.addf %120, %122 : vector<8x16xf32>
    %124 = math.absf %123 : vector<8x16xf32>
    %cst_61 = arith.constant 0.000000e+00 : f32
    %125 = vector.broadcast %cst_61 : f32 to vector<8x16xf32>
    %126 = arith.subf %125, %124 : vector<8x16xf32>
    %127 = math.exp %126 : vector<8x16xf32>
    %cst_62 = arith.constant 1.000000e+00 : f32
    %128 = vector.broadcast %cst_62 : f32 to vector<8x16xf32>
    %129 = arith.addf %128, %127 : vector<8x16xf32>
    %130 = tpu.reciprocal %129 {approx = true} : vector<8x16xf32> -> vector<8x16xf32>
    %cst_63 = arith.constant 0.000000e+00 : f32
    %131 = vector.broadcast %cst_63 : f32 to vector<8x16xf32>
    %132 = arith.cmpf oge, %123, %131 : vector<8x16xf32>
    %133 = arith.mulf %127, %130 : vector<8x16xf32>
    %134 = arith.select %132, %130, %133 : vector<8x16xi1>, vector<8x16xf32>
    %135 = arith.mulf %123, %134 : vector<8x16xf32>
    %136 = arith.truncf %135 : vector<8x16xf32> to vector<8x16xbf16>
    %c0_64 = arith.constant 0 : index
    %c0_65 = arith.constant 0 : index
    %137 = vector.load %arg19[%c0_64, %c0_65] : memref<16x32xbf16, #tpu.memory_space<vmem>>, vector<16x32xbf16>
    %cst_66 = arith.constant dense<0.000000e+00> : vector<8x32xf32>
    %138 = tpu.matmul %136, %137, %cst_66 {dimension_numbers = #tpu.dot_dimension_numbers<[1], [0], [0], [1], [0, 0, 1, 1], [], []>} : vector<8x16xbf16>, vector<16x32xbf16>, vector<8x32xf32> -> vector<8x32xf32>
    %c0_67 = arith.constant 0 : index
    %c0_68 = arith.constant 0 : index
    %139 = vector.load %arg20[%c0_67, %c0_68] : memref<1x32xf32, #tpu.memory_space<vmem>>, vector<1x32xf32>
    %140 = vector.broadcast %139 : vector<1x32xf32> to vector<8x32xf32>
    %141 = arith.addf %138, %140 : vector<8x32xf32>
    %142 = math.absf %141 : vector<8x32xf32>
    %cst_69 = arith.constant 0.000000e+00 : f32
    %143 = vector.broadcast %cst_69 : f32 to vector<8x32xf32>
    %144 = arith.subf %143, %142 : vector<8x32xf32>
    %145 = math.exp %144 : vector<8x32xf32>
    %cst_70 = arith.constant 1.000000e+00 : f32
    %146 = vector.broadcast %cst_70 : f32 to vector<8x32xf32>
    %147 = arith.addf %146, %145 : vector<8x32xf32>
    %148 = tpu.reciprocal %147 {approx = true} : vector<8x32xf32> -> vector<8x32xf32>
    %cst_71 = arith.constant 0.000000e+00 : f32
    %149 = vector.broadcast %cst_71 : f32 to vector<8x32xf32>
    %150 = arith.cmpf oge, %141, %149 : vector<8x32xf32>
    %151 = arith.mulf %145, %148 : vector<8x32xf32>
    %152 = arith.select %150, %148, %151 : vector<8x32xi1>, vector<8x32xf32>
    %153 = arith.mulf %141, %152 : vector<8x32xf32>
    %154 = arith.truncf %153 : vector<8x32xf32> to vector<8x32xbf16>
    %c0_72 = arith.constant 0 : index
    %c0_73 = arith.constant 0 : index
    %155 = vector.load %arg21[%c0_72, %c0_73] : memref<32x64xbf16, #tpu.memory_space<vmem>>, vector<32x64xbf16>
    %cst_74 = arith.constant dense<0.000000e+00> : vector<8x64xf32>
    %156 = tpu.matmul %154, %155, %cst_74 {dimension_numbers = #tpu.dot_dimension_numbers<[1], [0], [0], [1], [0, 0, 1, 1], [], []>} : vector<8x32xbf16>, vector<32x64xbf16>, vector<8x64xf32> -> vector<8x64xf32>
    %c0_75 = arith.constant 0 : index
    %c0_76 = arith.constant 0 : index
    %157 = vector.load %arg22[%c0_75, %c0_76] : memref<1x64xf32, #tpu.memory_space<vmem>>, vector<1x64xf32>
    %158 = vector.broadcast %157 : vector<1x64xf32> to vector<8x64xf32>
    %159 = arith.addf %156, %158 : vector<8x64xf32>
    %160 = math.absf %159 : vector<8x64xf32>
    %cst_77 = arith.constant 0.000000e+00 : f32
    %161 = vector.broadcast %cst_77 : f32 to vector<8x64xf32>
    %162 = arith.subf %161, %160 : vector<8x64xf32>
    %163 = math.exp %162 : vector<8x64xf32>
    %cst_78 = arith.constant 1.000000e+00 : f32
    %164 = vector.broadcast %cst_78 : f32 to vector<8x64xf32>
    %165 = arith.addf %164, %163 : vector<8x64xf32>
    %166 = tpu.reciprocal %165 {approx = true} : vector<8x64xf32> -> vector<8x64xf32>
    %cst_79 = arith.constant 0.000000e+00 : f32
    %167 = vector.broadcast %cst_79 : f32 to vector<8x64xf32>
    %168 = arith.cmpf oge, %159, %167 : vector<8x64xf32>
    %169 = arith.mulf %163, %166 : vector<8x64xf32>
    %170 = arith.select %168, %166, %169 : vector<8x64xi1>, vector<8x64xf32>
    %171 = arith.mulf %159, %170 : vector<8x64xf32>
    %172 = arith.truncf %171 : vector<8x64xf32> to vector<8x64xbf16>
    %c0_80 = arith.constant 0 : index
    %c0_81 = arith.constant 0 : index
    %173 = vector.load %arg23[%c0_80, %c0_81] : memref<64x64xbf16, #tpu.memory_space<vmem>>, vector<64x64xbf16>
    %cst_82 = arith.constant dense<0.000000e+00> : vector<8x64xf32>
    %174 = tpu.matmul %172, %173, %cst_82 {dimension_numbers = #tpu.dot_dimension_numbers<[1], [0], [0], [1], [0, 0, 1, 1], [], []>} : vector<8x64xbf16>, vector<64x64xbf16>, vector<8x64xf32> -> vector<8x64xf32>
    %c0_83 = arith.constant 0 : index
    %c0_84 = arith.constant 0 : index
    %175 = vector.load %arg24[%c0_83, %c0_84] : memref<1x64xf32, #tpu.memory_space<vmem>>, vector<1x64xf32>
    %176 = vector.broadcast %175 : vector<1x64xf32> to vector<8x64xf32>
    %177 = arith.addf %174, %176 : vector<8x64xf32>
    %178 = math.absf %177 : vector<8x64xf32>
    %cst_85 = arith.constant 0.000000e+00 : f32
    %179 = vector.broadcast %cst_85 : f32 to vector<8x64xf32>
    %180 = arith.subf %179, %178 : vector<8x64xf32>
    %181 = math.exp %180 : vector<8x64xf32>
    %cst_86 = arith.constant 1.000000e+00 : f32
    %182 = vector.broadcast %cst_86 : f32 to vector<8x64xf32>
    %183 = arith.addf %182, %181 : vector<8x64xf32>
    %184 = tpu.reciprocal %183 {approx = true} : vector<8x64xf32> -> vector<8x64xf32>
    %cst_87 = arith.constant 0.000000e+00 : f32
    %185 = vector.broadcast %cst_87 : f32 to vector<8x64xf32>
    %186 = arith.cmpf oge, %177, %185 : vector<8x64xf32>
    %187 = arith.mulf %181, %184 : vector<8x64xf32>
    %188 = arith.select %186, %184, %187 : vector<8x64xi1>, vector<8x64xf32>
    %cst_88 = arith.constant 0.000000e+00 : f32
    %189 = vector.broadcast %cst_88 : f32 to vector<8x64xf32>
    %190 = arith.maximumf %177, %189 : vector<8x64xf32>
    %cst_89 = arith.constant 1.000000e+00 : f32
    %191 = vector.broadcast %cst_89 : f32 to vector<8x64xf32>
    %192 = arith.addf %191, %181 : vector<8x64xf32>
    %193 = math.log %192 : vector<8x64xf32>
    %194 = arith.addf %190, %193 : vector<8x64xf32>
    %195 = arith.mulf %0, %177 : vector<8x64xf32>
    %196 = arith.subf %194, %195 : vector<8x64xf32>
    %cst_90 = arith.constant dense<0.000000e+00> : vector<8xf32>
    %197 = vector.multi_reduction <add>, %196, %cst_90 [1] : vector<8x64xf32> to vector<8xf32>
    %198 = vector.shape_cast %197 : vector<8xf32> to vector<8x1xf32>
    %199 = arith.mulf %96, %96 : vector<8x8xf32>
    %200 = arith.mulf %78, %78 : vector<8x8xf32>
    %201 = arith.addf %199, %200 : vector<8x8xf32>
    %cst_91 = arith.constant 1.000000e+00 : f32
    %202 = vector.broadcast %cst_91 : f32 to vector<8x8xf32>
    %203 = arith.subf %201, %202 : vector<8x8xf32>
    %cst_92 = arith.constant dense<0.000000e+00> : vector<8xf32>
    %204 = vector.multi_reduction <add>, %203, %cst_92 [1] : vector<8x8xf32> to vector<8xf32>
    %205 = vector.shape_cast %204 : vector<8xf32> to vector<8x1xf32>
    %cst_93 = arith.constant 5.000000e-01 : f32
    %206 = vector.broadcast %cst_93 : f32 to vector<8x1xf32>
    %207 = arith.mulf %206, %205 : vector<8x1xf32>
    %208 = math.log %96 : vector<8x8xf32>
    %cst_94 = arith.constant dense<0.000000e+00> : vector<8xf32>
    %209 = vector.multi_reduction <add>, %208, %cst_94 [1] : vector<8x8xf32> to vector<8xf32>
    %210 = vector.shape_cast %209 : vector<8xf32> to vector<8x1xf32>
    %211 = arith.subf %207, %210 : vector<8x1xf32>
    %cst_95 = arith.constant 0.000000e+00 : f32
    %212 = vector.broadcast %cst_95 : f32 to vector<8x38xf32>
    %213 = tpu.concatenate %188, %78, %96, %99, %198, %211, %212 in 1 : vector<8x64xf32>, vector<8x8xf32>, vector<8x8xf32>, vector<8x8xf32>, vector<8x1xf32>, vector<8x1xf32>, vector<8x38xf32> -> vector<8x128xf32>
    %c0_96 = arith.constant 0 : index
    %c0_97 = arith.constant 0 : index
    %214 = vector.load %arg25[%c0_96, %c0_97] : memref<8x128xf32, #tpu.memory_space<vmem>>, vector<8x128xf32>
    tpu.vector_store %arg25[%c0_96, %c0_97], %213 {strides = array<i32>} : memref<8x128xf32, #tpu.memory_space<vmem>>, vector<8x128xf32>,
    return
  }
  func.func @transform_0(%arg0: i32) -> (i32, i32) {
    %c0_i32 = arith.constant 0 : i32
    %c0_i32_0 = arith.constant 0 : i32
    return %arg0, %c0_i32 : i32, i32
  }
  func.func @transform_1(%arg0: i32) -> (i32, i32) {
    %c0_i32 = arith.constant 0 : i32
    %c0_i32_0 = arith.constant 0 : i32
    return %arg0, %c0_i32 : i32, i32
  }
  func.func @transform_2(%arg0: i32) -> (i32, i32) {
    %c0_i32 = arith.constant 0 : i32
    %c0_i32_0 = arith.constant 0 : i32
    %c0_i32_1 = arith.constant 0 : i32
    return %c0_i32, %c0_i32_0 : i32, i32
  }
  func.func @transform_3(%arg0: i32) -> (i32, i32) {
    %c0_i32 = arith.constant 0 : i32
    %c0_i32_0 = arith.constant 0 : i32
    %c0_i32_1 = arith.constant 0 : i32
    return %c0_i32, %c0_i32_0 : i32, i32
  }
  func.func @transform_4(%arg0: i32) -> (i32, i32) {
    %c0_i32 = arith.constant 0 : i32
    %c0_i32_0 = arith.constant 0 : i32
    %c0_i32_1 = arith.constant 0 : i32
    return %c0_i32, %c0_i32_0 : i32, i32
  }
  func.func @transform_5(%arg0: i32) -> (i32, i32) {
    %c0_i32 = arith.constant 0 : i32
    %c0_i32_0 = arith.constant 0 : i32
    %c0_i32_1 = arith.constant 0 : i32
    return %c0_i32, %c0_i32_0 : i32, i32
  }
  func.func @transform_6(%arg0: i32) -> (i32, i32) {
    %c0_i32 = arith.constant 0 : i32
    %c0_i32_0 = arith.constant 0 : i32
    %c0_i32_1 = arith.constant 0 : i32
    return %c0_i32, %c0_i32_0 : i32, i32
  }
  func.func @transform_7(%arg0: i32) -> (i32, i32) {
    %c0_i32 = arith.constant 0 : i32
    %c0_i32_0 = arith.constant 0 : i32
    %c0_i32_1 = arith.constant 0 : i32
    return %c0_i32, %c0_i32_0 : i32, i32
  }
  func.func @transform_8(%arg0: i32) -> (i32, i32) {
    %c0_i32 = arith.constant 0 : i32
    %c0_i32_0 = arith.constant 0 : i32
    %c0_i32_1 = arith.constant 0 : i32
    return %c0_i32, %c0_i32_0 : i32, i32
  }
  func.func @transform_9(%arg0: i32) -> (i32, i32) {
    %c0_i32 = arith.constant 0 : i32
    %c0_i32_0 = arith.constant 0 : i32
    %c0_i32_1 = arith.constant 0 : i32
    return %c0_i32, %c0_i32_0 : i32, i32
  }
  func.func @transform_10(%arg0: i32) -> (i32, i32) {
    %c0_i32 = arith.constant 0 : i32
    %c0_i32_0 = arith.constant 0 : i32
    %c0_i32_1 = arith.constant 0 : i32
    return %c0_i32, %c0_i32_0 : i32, i32
  }
  func.func @transform_11(%arg0: i32) -> (i32, i32) {
    %c0_i32 = arith.constant 0 : i32
    %c0_i32_0 = arith.constant 0 : i32
    %c0_i32_1 = arith.constant 0 : i32
    return %c0_i32, %c0_i32_0 : i32, i32
  }
  func.func @transform_12(%arg0: i32) -> (i32, i32) {
    %c0_i32 = arith.constant 0 : i32
    %c0_i32_0 = arith.constant 0 : i32
    %c0_i32_1 = arith.constant 0 : i32
    return %c0_i32, %c0_i32_0 : i32, i32
  }
  func.func @transform_13(%arg0: i32) -> (i32, i32) {
    %c0_i32 = arith.constant 0 : i32
    %c0_i32_0 = arith.constant 0 : i32
    %c0_i32_1 = arith.constant 0 : i32
    return %c0_i32, %c0_i32_0 : i32, i32
  }
  func.func @transform_14(%arg0: i32) -> (i32, i32) {
    %c0_i32 = arith.constant 0 : i32
    %c0_i32_0 = arith.constant 0 : i32
    %c0_i32_1 = arith.constant 0 : i32
    return %c0_i32, %c0_i32_0 : i32, i32
  }
  func.func @transform_15(%arg0: i32) -> (i32, i32) {
    %c0_i32 = arith.constant 0 : i32
    %c0_i32_0 = arith.constant 0 : i32
    %c0_i32_1 = arith.constant 0 : i32
    return %c0_i32, %c0_i32_0 : i32, i32
  }
  func.func @transform_16(%arg0: i32) -> (i32, i32) {
    %c0_i32 = arith.constant 0 : i32
    %c0_i32_0 = arith.constant 0 : i32
    %c0_i32_1 = arith.constant 0 : i32
    return %c0_i32, %c0_i32_0 : i32, i32
  }
  func.func @transform_17(%arg0: i32) -> (i32, i32) {
    %c0_i32 = arith.constant 0 : i32
    %c0_i32_0 = arith.constant 0 : i32
    %c0_i32_1 = arith.constant 0 : i32
    return %c0_i32, %c0_i32_0 : i32, i32
  }
  func.func @transform_18(%arg0: i32) -> (i32, i32) {
    %c0_i32 = arith.constant 0 : i32
    %c0_i32_0 = arith.constant 0 : i32
    %c0_i32_1 = arith.constant 0 : i32
    return %c0_i32, %c0_i32_0 : i32, i32
  }
  func.func @transform_19(%arg0: i32) -> (i32, i32) {
    %c0_i32 = arith.constant 0 : i32
    %c0_i32_0 = arith.constant 0 : i32
    %c0_i32_1 = arith.constant 0 : i32
    return %c0_i32, %c0_i32_0 : i32, i32
  }
  func.func @transform_20(%arg0: i32) -> (i32, i32) {
    %c0_i32 = arith.constant 0 : i32
    %c0_i32_0 = arith.constant 0 : i32
    %c0_i32_1 = arith.constant 0 : i32
    return %c0_i32, %c0_i32_0 : i32, i32
  }
  func.func @transform_21(%arg0: i32) -> (i32, i32) {
    %c0_i32 = arith.constant 0 : i32
    %c0_i32_0 = arith.constant 0 : i32
    %c0_i32_1 = arith.constant 0 : i32
    return %c0_i32, %c0_i32_0 : i32, i32
  }
  func.func @transform_22(%arg0: i32) -> (i32, i32) {
    %c0_i32 = arith.constant 0 : i32
    %c0_i32_0 = arith.constant 0 : i32
    %c0_i32_1 = arith.constant 0 : i32
    return %c0_i32, %c0_i32_0 : i32, i32
  }
  func.func @transform_23(%arg0: i32) -> (i32, i32) {
    %c0_i32 = arith.constant 0 : i32
    %c0_i32_0 = arith.constant 0 : i32
    %c0_i32_1 = arith.constant 0 : i32
    return %c0_i32, %c0_i32_0 : i32, i32
  }
  func.func @transform_24(%arg0: i32) -> (i32, i32) {
    %c0_i32 = arith.constant 0 : i32
    %c0_i32_0 = arith.constant 0 : i32
    return %arg0, %c0_i32 : i32, i32
  }
}

</mosaic_0001>

<bundles_post_ra>
// kernel: tpu_custom_call.1
= control target key start
LH: loop header
LB: loop body
LE: loop exit
PB: predicated region body
PF: predicated region fallthrough
CT: control target
= control target key end

     0   :  { %s1541_s0 = inlined_call_operand.vmem [shape: f32[8,64], index: 0, kind: input, shape index: {}]   ;;  %s1542_s1 = inlined_call_operand.hbm [shape: f32[8,8], index: 1, kind: input, shape index: {}]   ;;  %s1543_s2 = inlined_call_operand.vmem [shape: bf16[64,64], index: 2, kind: input, shape index: {}]   ;;  %s1544_s3 = inlined_call_operand.vmem [shape: f32[1,64], index: 3, kind: input, shape index: {}]   ;;  %s1545_s4 = inlined_call_operand.vmem [shape: bf16[64,32], index: 4, kind: input, shape index: {}]   ;;  %s1546_s5 = inlined_call_operand.hbm [shape: f32[1,32], index: 5, kind: input, shape index: {}]   ;;  %s1547_s6 = inlined_call_operand.vmem [shape: bf16[32,16], index: 6, kind: input, shape index: {}]   ;;  %s1548_s7 = inlined_call_operand.hbm [shape: f32[1,16], index: 7, kind: input, shape index: {}]   ;;  %s1549_s8 = inlined_call_operand.vmem [shape: bf16[16,8], index: 8, kind: input, shape index: {}]   ;;  %s1550_s9 = inlined_call_operand.hbm [shape: f32[1,8], index: 9, kind: input, shape index: {}]   ;;  %s1551_s10 = inlined_call_operand.vmem [shape: bf16[8,8], index: 10, kind: input, shape index: {}]   ;;  %s1552_s11 = inlined_call_operand.hbm [shape: f32[1,8], index: 11, kind: input, shape index: {}]   ;;  %s1553_s12 = inlined_call_operand.hbm [shape: bf16[8,8], index: 12, kind: input, shape index: {}]   ;;  %s1554_s13 = inlined_call_operand.hbm [shape: f32[1,8], index: 13, kind: input, shape index: {}]   ;;  %s1555_s14 = inlined_call_operand.hbm [shape: bf16[8,8], index: 14, kind: input, shape index: {}]   ;;  %s1556_s15 = inlined_call_operand.hbm [shape: f32[1,8], index: 15, kind: input, shape index: {}]   ;;  %s1557_s16 = inlined_call_operand.hbm [shape: bf16[8,16], index: 16, kind: input, shape index: {}]   ;;  %s1558_s17 = inlined_call_operand.vmem [shape: f32[1,16], index: 17, kind: input, shape index: {}]   ;;  %s1559_s18 = inlined_call_operand.vmem [shape: bf16[16,32], index: 18, kind: input, shape index: {}]   ;;  %s1560_s19 = inlined_call_operand.vmem [shape: f32[1,32], index: 19, kind: input, shape index: {}]   ;;  %s1561_s20 = inlined_call_operand.vmem [shape: bf16[32,64], index: 20, kind: input, shape index: {}]   ;;  %s1562_s21 = inlined_call_operand.vmem [shape: f32[1,64], index: 21, kind: input, shape index: {}]   ;;  %s1563_s22 = inlined_call_operand.hbm [shape: bf16[64,64], index: 22, kind: input, shape index: {}]   ;;  %s1564_s23 = inlined_call_operand.vmem [shape: f32[1,64], index: 23, kind: input, shape index: {}]   ;;  %s1565_s24 = inlined_call_operand.hbm [shape: f32[8,128], index: 24, kind: output, shape index: {}]  }
   0x1   :  { %1569 = sst [smem:[#allocation28_spill]] %s1541_s0 }
   0x2   :  { %1570 = sst [smem:[#allocation29_spill]] %s1542_s1 }
   0x3   :  { %1571 = sst [smem:[#allocation30_spill]] %s1543_s2 }
   0x4   :  { %1572 = sst [smem:[#allocation31_spill]] %s1544_s3 }
   0x5   :  { %1573 = sst [smem:[#allocation32_spill]] %s1545_s4 }
   0x6   :  { %1574 = sst [smem:[#allocation33_spill]] %s1546_s5 }
   0x7   :  { %1575 = sst [smem:[#allocation34_spill]] %s1547_s6 }
   0x8   :  { %1576 = sst [smem:[#allocation35_spill]] %s1548_s7 }
   0x9   :  { %1577 = sst [smem:[#allocation36_spill]] %s1549_s8 }
   0xa   :  { %29 = vsyncpa [#allocation3], 0 }
   0xb   :  { %30 = vsyncpa [#allocation6], 0 }
   0xc   :  { %31 = vsyncpa [#allocation9], 0 }
   0xd   :  { %32 = vsyncpa [#allocation12], 0 }
   0xe   :  { %33 = vsyncpa [#allocation15], 0 }
   0xf   :  { %34 = vsyncpa [#allocation18], 0  ;;  %s1578_s27 = sld [smem:[#allocation33_spill]] }
  0x15   :  { %s60_s28 = sshll.u32 %s1578_s27, 4  ;;  %s61_s28 = int_to_ptr.hbm [resolvable:$true] %s60_s28 }
  0x16   :  { %35 = vsyncpa [#allocation4], 0  ;;  %s1269_s6 = smov [#allocation5]   ;;  %s86_s7 = sshll.u32 %s1550_s9, 4  ;;  %s87_s7 = int_to_ptr.hbm [resolvable:$true] %s86_s7 }
  0x17   :  { %s62_s2 = sshll.u32 %s1269_s6, 4  ;;  %s1270_s30 = smov [#allocation8]   ;;  %s63_s2 = int_to_ptr.vmem [resolvable:$true] %s62_s2 }
  0x18   :  { %65 = dma.hbm_to_vmem [thread:$0]  %s61_s28, 16, %s63_s2, [#allocation6]  }
  0x19   :  { %s88_s3 = sshll.u32 %s1270_s30, 4  ;;  %s110_s4 = sshll.u32 %s1553_s12, 4  ;;  %s89_s3 = int_to_ptr.vmem [resolvable:$true] %s88_s3  ;;  %s111_s4 = int_to_ptr.hbm [resolvable:$true] %s110_s4 }
  0x1a   :  { %91 = dma.hbm_to_vmem [thread:$0]  %s87_s7, 16, %s89_s3, [#allocation9]  }
  0x1b   :  { %s132_s26 = sshll.u32 %s1555_s14, 4  ;;  %s1271_s27 = smov [#allocation11]   ;;  %s133_s26 = int_to_ptr.hbm [resolvable:$true] %s132_s26 }
  0x1c   :  { %s112_s6 = sshll.u32 %s1271_s27, 4  ;;  %s1272_s9 = smov [#allocation14]   ;;  %s113_s6 = int_to_ptr.vmem [resolvable:$true] %s112_s6 }
  0x1d   :  { %115 = dma.hbm_to_vmem [thread:$0]  %s111_s4, 64, %s113_s6, [#allocation12]  }
  0x1e   :  { %s134_s28 = sshll.u32 %s1272_s9, 4  ;;  %s154_s0 = sshll.u32 %s1557_s16, 4  ;;  %s135_s28 = int_to_ptr.vmem [resolvable:$true] %s134_s28  ;;  %s155_s0 = int_to_ptr.hbm [resolvable:$true] %s154_s0 }
  0x1f   :  { %137 = dma.hbm_to_vmem [thread:$0]  %s133_s26, 64, %s135_s28, [#allocation15]  }
  0x20   :  { %s1579_s30 = sld [smem:[#allocation29_spill]]  ;;  %s1273_s25 = smov [#allocation17]  }
  0x21   :  { %s156_s14 = sshll.u32 %s1273_s25, 4  ;;  %s1274_s8 = smov [#allocation2]   ;;  %s157_s14 = int_to_ptr.vmem [resolvable:$true] %s156_s14 }
  0x22   :  { %159 = dma.hbm_to_vmem [thread:$0]  %s155_s0, 64, %s157_s14, [#allocation18]  }
  0x23   :  { %s45_s4 = sshll.u32 %s1274_s8, 4  ;;  %s1580_s27 = sld [smem:[#allocation35_spill]]  ;;  %s46_s4 = int_to_ptr.vmem [resolvable:$true] %s45_s4 }
  0x24   :  { %s99_s9 = sshll.u32 %s1552_s11, 4  ;;  %s1275_s28 = smov [#allocation7]   ;;  %s100_s9 = int_to_ptr.hbm [resolvable:$true] %s99_s9 }
  0x25   :  { %s75_s2 = sshll.u32 %s1275_s28, 4  ;;  %s1276_s29 = smov [#allocation10]   ;;  %s76_s2 = int_to_ptr.vmem [resolvable:$true] %s75_s2 }
  0x26   :  { %s43_s3 = sshll.u32 %s1579_s30, 4  ;;  %s101_s0 = sshll.u32 %s1276_s29, 4  ;;  %s44_s3 = int_to_ptr.hbm [resolvable:$true] %s43_s3  ;;  %s102_s0 = int_to_ptr.vmem [resolvable:$true] %s101_s0 }
  0x27   :  { %48 = dma.hbm_to_vmem [thread:$0]  %s44_s3, 128, %s46_s4, [#allocation3]  }
  0x28   :  { %s121_s30 = sshll.u32 %s1554_s13, 4  ;;  %s143_s14 = sshll.u32 %s1556_s15, 4  ;;  %s122_s30 = int_to_ptr.hbm [resolvable:$true] %s121_s30  ;;  %s144_s14 = int_to_ptr.hbm [resolvable:$true] %s143_s14 }
  0x29   :  { %s73_s6 = sshll.u32 %s1580_s27, 4  ;;  %s1277_s8 = smov [#allocation13]   ;;  %s74_s6 = int_to_ptr.hbm [resolvable:$true] %s73_s6 }
  0x2a   :  { %78 = dma.hbm_to_vmem [thread:$0]  %s74_s6, 16, %s76_s2, [#allocation6]  }
  0x2b   :  { %104 = dma.hbm_to_vmem [thread:$0]  %s100_s9, 16, %s102_s0, [#allocation9]  }
  0x2c   :  { %s123_s11 = sshll.u32 %s1277_s8, 4  ;;  %s1278_s4 = smov [#allocation16]   ;;  %s124_s11 = int_to_ptr.vmem [resolvable:$true] %s123_s11 }
  0x2d   :  { %126 = dma.hbm_to_vmem [thread:$0]  %s122_s30, 16, %s124_s11, [#allocation12]  }
  0x2e   :  { %s145_s1 = sshll.u32 %s1278_s4, 4  ;;  %s174_s6 = sshll.u32 %s1563_s22, 4  ;;  %s146_s1 = int_to_ptr.vmem [resolvable:$true] %s145_s1  ;;  %s175_s6 = int_to_ptr.hbm [resolvable:$true] %s174_s6 }
  0x2f   :  { %148 = dma.hbm_to_vmem [thread:$0]  %s144_s14, 16, %s146_s1, [#allocation15]  }
  0x30   :  { %s1279_s13 = smov [#allocation19]   ;;  %s1280_s26 = smov 64  }
  0x31   :  { %s176_s16 = sshll.u32 %s1279_s13, 4  ;;  %s1281_s9 = smov 4   ;;  %s177_s16 = int_to_ptr.vmem [resolvable:$true] %s176_s16 }
  0x32   :  { %182 = dma.hbm_to_vmem [thread:$0]  %s175_s6, 512, %s177_s16, [#allocation18], %s1280_s26, %s1280_s26, %s1281_s9  }
  0x33   :  { %1255 = dma.done.wait [#allocation3], 128  }
  0x34   :  { %1256 = vsyncadd [#allocation3], 4294967168 }
  0x35   :  { %1257 = dma.done.wait [#allocation6], 32  }
  0x36   :  { %1258 = vsyncadd [#allocation6], 4294967264 }
  0x37   :  { %1259 = dma.done.wait [#allocation9], 32  }
  0x38   :  { %1260 = vsyncadd [#allocation9], 4294967264 }
  0x39   :  { %1261 = dma.done.wait [#allocation12], 80  }
  0x3a   :  { %1262 = vsyncadd [#allocation12], 4294967216 }
  0x3b   :  { %1263 = dma.done.wait [#allocation15], 80  }
  0x3c   :  { %1264 = vsyncadd [#allocation15], 4294967216 }
  0x3d   :  { %1265 = dma.done.wait [#allocation18], 576  }
  0x3e   :  { %1266 = vsyncadd [#allocation18], 4294966720  ;;  %s1581_s28 = sld [smem:[#allocation30_spill]]  ;;  %vm268_vm0 = vcmask 523264   ;;  %v913_v26 = vld [vmem:[#allocation5] ss:$0 sm:$0xff] }
  0x3f   :  { %s1582_s14 = sld [smem:[#allocation28_spill]]  ;;  %vm379_vm3 = vcmask 261120   ;;  %v914_v41 = vld [vmem:[#allocation7] ss:$0 sm:$0xff]  ;;  %vm419_vm5 = vcmask 130048   ;;  %vm456_vm6 = vcmask 1043456  }
  0x40   :  { %s1583_s4 = sld [smem:[#allocation32_spill]]  ;;  %v473_v55 = vld [vmem:[#allocation11] sm:$0xf]  ;;  %v447_v56 = vld [vmem:[%s1551_s10] sm:$0xf]  ;;  %vm452_vm8 = vcmask 64512  }
  0x41   :  { %s1584_s22 = sld [smem:[#allocation31_spill]]  ;;  %v479_v57 = vsel %vm456_vm6, %v473_v55, 0  ;;  %v458_v58 = vsel %vm456_vm6, %v447_v56, 0  ;;  %v915_v59 = vld [vmem:[#allocation8] ss:$0 sm:$0xff]  ;;  %s1282_s10 = smov 72  }
  0x42   :  { %s1585_s29 = sld [smem:[#allocation34_spill]]  ;;  %vm761_vm14 = vcmask 588800   ;;  %vm763_vm15 = vcmask 654336   ;;  %s1284_s16 = smov [#allocation20]  }
  0x43   :  { %s1586_s25 = sld [smem:[#allocation36_spill]]  ;;  %s777_s9 = sshll.u32 %s1284_s16, 4  ;;  %s778_s9 = int_to_ptr.vmem [resolvable:$true] %s777_s9 }
  0x44   :  { %v881_v0 = vld [vmem:[%s1581_s28 + $0x18] sm:$0xff]  ;;  %v880_v1 = vld [vmem:[%s1581_s28 + $0x10] sm:$0xff]  ;;  %v879_v2 = vld [vmem:[%s1581_s28 + $0x8] sm:$0xff] }
  0x45   :  { %276 = vmatpush.bf16.msra.mxu0 %v881_v0  ;;  %v878_v3 = vld [vmem:[%s1581_s28] sm:$0xff]  ;;  %s779_s28 = sshll.u32 %s1565_s24, 4  ;;  %s780_s28 = int_to_ptr.hbm [resolvable:$true] %s779_s28 }
  0x46   :  { %v1460_v4 = vld [vmem:[%s1582_s14] sm:$0xff]  ;;  %v885_v6 = vld [vmem:[%s1583_s4 + $0x18] sm:$0xff]  ;;  %v884_v7 = vld [vmem:[%s1583_s4 + $0x10] sm:$0xff] }
  0x47   :  { %v231_v5 = vpack.c.bf16 %v1460_v4, %v1460_v4  ;;  %339 = vmatpush.bf16.msra.mxu1 %v885_v6  ;;  %v883_v8 = vld [vmem:[%s1583_s4 + $0x8] sm:$0xff]  ;;  %v882_v9 = vld [vmem:[%s1583_s4] sm:$0xff] }
  0x48   :  { %v912_v10 = vld [vmem:[%s1584_s22] ss:$0 sm:$0xff]  ;;  %v887_v24 = vld [vmem:[%s1585_s29 + $0x8] sm:$0xff] }
  0x49   :  { %277 = vmatpush.bf16.msra.mxu0 %v880_v1  ;;  %389 = vmatpush.bf16.msra.mxu2 %v887_v24  ;;  %v886_v25 = vld [vmem:[%s1585_s29] sm:$0xff] }
  0x4a   :  { %v888_v40 = vld [vmem:[%s1586_s25] sm:$0xff] }
  0x4b   :  { %340 = vmatpush.bf16.msra.mxu1 %v884_v7  ;;  %430 = vmatpush.bf16.msra.mxu3 %v888_v40 }
  0x4d   :  { %278 = vmatpush.bf16.msra.mxu0 %v879_v2  ;;  %390 = vmatpush.bf16.msra.mxu2 %v886_v25 }
  0x4f   :  { %341 = vmatpush.bf16.msra.mxu1 %v883_v8  ;;  %467 = vmatpush.bf16.msrb.mxu3 %v458_v58  ;;  %v889_v58 = vld [vmem:[%s1559_s18] sm:$0xff] }
  0x51   :  { %279 = vmatpush.bf16.msra.mxu0 %v878_v3  ;;  %488 = vmatpush.bf16.msrb.mxu2 %v479_v57 }
  0x53   :  { %342 = vmatpush.bf16.msra.mxu1 %v882_v9 }
  0x54   :  { %810 = vmatmul.msk.bf16.vlgmr.msra.gmra.mxu0 %vm268_vm0, %v231_v5 }
  0xd1   :  { %v281_v11 = vpop.f32.mrf.mxu0 }
  0xd2   :  { %v282_v12 = vadd.f32 %v912_v10, %v281_v11  ;;  %v917_v10 = vld [vmem:[#allocation13] ss:$0 sm:$0xff]  ;;  %v508_v11 = vld [vmem:[#allocation14] sm:$0xf] }
  0xd4   :  { %v285_v13 = vand.u32 2147483647, %v282_v12  ;;  %vm291_vm1 = vcmp.ge.f32.partialorder %v282_v12, 0.0 }
  0xd6   :  { %v286_v14 = vsub.f32 0.0, %v285_v13 }
  0xd8   :  { %v287_v15 = vmul.f32 1.442695, %v286_v14 }
  0xd9   :  { %v283_v16 = vpop.f32.mrf.mxu0 }
  0xda   :  { %923 = vpow2.f32 %v287_v15 }
  0xe0   :  { %v924_v17 = vpop.eup %923 }
  0xe1   :  { %v289_v18 = vadd.f32 1.0, %v924_v17 }
  0xe3   :  { %925 = vrcp.f32 %v289_v18 }
  0xe9   :  { %v926_v19 = vpop.eup %925 }
  0xea   :  { %v292_v20 = vmul.f32 %v926_v19, %v924_v17 }
  0xec   :  { %v293_v21 = vsel %vm291_vm1, %v926_v19, %v292_v20  ;;  %vm765_vm1 = vcmask 719872  }
  0xed   :  { %v294_v22 = vmul.f32 %v293_v21, %v282_v12  ;;  %v517_v12 = vsel %vm456_vm6, %v508_v11, 0  ;;  %v890_v11 = vld [vmem:[%s1561_s20] sm:$0xff] }
  0xee   :  { %526 = vmatpush.bf16.msrb.mxu0 %v517_v12  ;;  %v920_v12 = vld [vmem:[%s1560_s19] ss:$0 sm:$0xff] }
  0xef   :  { %v295_v23 = vpack.c.bf16 %v294_v22, %v294_v22 }
  0xf1   :  { %827 = vmatmul.msk.bf16.vlgmr.msra.gmra.mxu1 %vm268_vm0, %v295_v23  ;;  %v916_v23 = vld [vmem:[#allocation10] ss:$0 sm:$0xff] }
 0x16e   :  { %v344_v27 = vpop.f32.mrf.mxu1 }
 0x16f   :  { %v345_v28 = vadd.f32 %v913_v26, %v344_v27 }
 0x171   :  { %v348_v29 = vand.u32 2147483647, %v345_v28  ;;  %vm354_vm2 = vcmp.ge.f32.partialorder %v345_v28, 0.0 }
 0x173   :  { %v349_v30 = vsub.f32 0.0, %v348_v29  ;;  %v504_v29 = vld [vmem:[#allocation2] sm:$0xff] }
 0x175   :  { %v350_v31 = vmul.f32 1.442695, %v349_v30 }
 0x176   :  { %v346_v32 = vpop.f32.mrf.mxu1 }
 0x177   :  { %927 = vpow2.f32 %v350_v31 }
 0x17d   :  { %v928_v33 = vpop.eup %927 }
 0x17e   :  { %v352_v34 = vadd.f32 1.0, %v928_v33 }
 0x180   :  { %929 = vrcp.f32 %v352_v34 }
 0x186   :  { %v930_v35 = vpop.eup %929 }
 0x187   :  { %v355_v36 = vmul.f32 %v930_v35, %v928_v33 }
 0x189   :  { %v356_v37 = vsel %vm354_vm2, %v930_v35, %v355_v36  ;;  %vm767_vm2 = vcmask 728064  }
 0x18a   :  { %v357_v38 = vmul.f32 %v356_v37, %v345_v28 }
 0x18c   :  { %v358_v39 = vpack.c.bf16 %v357_v38, %v357_v38 }
 0x18e   :  { %836 = vmatmul.msk.bf16.vlgmr.msra.gmra.mxu2 %vm379_vm3, %v358_v39 }
 0x211   :  { %v392_v42 = vpop.f32.mrf.mxu2 }
 0x212   :  { %v393_v43 = vadd.f32 %v914_v41, %v392_v42  ;;  %v543_v42 = vld [vmem:[#allocation17] sm:$0xf] }
 0x214   :  { %v396_v44 = vand.u32 2147483647, %v393_v43  ;;  %vm402_vm4 = vcmp.ge.f32.partialorder %v393_v43, 0.0 }
 0x216   :  { %v397_v45 = vsub.f32 0.0, %v396_v44  ;;  %v918_v44 = vld [vmem:[#allocation16] ss:$0 sm:$0xff] }
 0x218   :  { %v398_v46 = vmul.f32 1.442695, %v397_v45 }
 0x219   :  { %v394_v47 = vpop.f32.mrf.mxu2 }
 0x21a   :  { %931 = vpow2.f32 %v398_v46 }
 0x220   :  { %v932_v48 = vpop.eup %931 }
 0x221   :  { %v400_v49 = vadd.f32 1.0, %v932_v48 }
 0x223   :  { %933 = vrcp.f32 %v400_v49 }
 0x229   :  { %v934_v50 = vpop.eup %933 }
 0x22a   :  { %v403_v51 = vmul.f32 %v934_v50, %v932_v48 }
 0x22c   :  { %v404_v52 = vsel %vm402_vm4, %v934_v50, %v403_v51 }
 0x22d   :  { %v405_v53 = vmul.f32 %v404_v52, %v393_v43  ;;  %v552_v43 = vsel %vm456_vm6, %v543_v42, 0 }
 0x22e   :  { %561 = vmatpush.bf16.msrb.mxu1 %v552_v43 }
 0x22f   :  { %v406_v54 = vpack.c.bf16 %v405_v53, %v405_v53 }
 0x231   :  { %841 = vmatmul.msk.bf16.vlgmr.msra.gmra.mxu3 %vm419_vm5, %v406_v54 }
 0x232   :  { %600 = vmatpush.bf16.msra.mxu3 %v889_v58 }
 0x2b4   :  { %v432_v60 = vpop.f32.mrf.mxu3 }
 0x2b5   :  { %v433_v61 = vadd.f32 %v915_v59, %v432_v60  ;;  %v919_v59 = vld [vmem:[%s1558_s17] ss:$0 sm:$0xff] }
 0x2b7   :  { %v436_v62 = vand.u32 2147483647, %v433_v61  ;;  %vm442_vm7 = vcmp.ge.f32.partialorder %v433_v61, 0.0 }
 0x2b9   :  { %v437_v63 = vsub.f32 0.0, %v436_v62 }
 0x2bb   :  { %v438_v0 = vmul.f32 1.442695, %v437_v63 }
 0x2bc   :  { %v434_v1 = vpop.f32.mrf.mxu3 }
 0x2bd   :  { %935 = vpow2.f32 %v438_v0 }
 0x2c3   :  { %v936_v2 = vpop.eup %935 }
 0x2c4   :  { %v440_v3 = vadd.f32 1.0, %v936_v2 }
 0x2c6   :  { %937 = vrcp.f32 %v440_v3 }
 0x2cc   :  { %v938_v5 = vpop.eup %937 }
 0x2cd   :  { %v443_v6 = vmul.f32 %v938_v5, %v936_v2 }
 0x2cf   :  { %v444_v7 = vsel %vm442_vm7, %v938_v5, %v443_v6 }
 0x2d0   :  { %v445_v8 = vmul.f32 %v444_v7, %v433_v61 }
 0x2d2   :  { %v446_v9 = vpack.c.bf16 %v445_v8, %v445_v8 }
 0x2d4   :  { %842 = vmatmul.msk.bf16.vlgmr.msrb.gmra.mxu3 %vm452_vm8, %v446_v9  ;;  %843 = vmatmul.msk.bf16.vlgmr.msrb.gmra.mxu2 %vm452_vm8, %v446_v9 }
 0x357   :  { %v469_v13 = vpop.f32.mrf.mxu3  ;;  %v490_v14 = vpop.f32.mrf.mxu2 }
 0x358   :  { %v491_v15 = vadd.f32 %v917_v10, %v490_v14  ;;  %v470_v27 = vadd.f32 %v916_v23, %v469_v13  ;;  %v891_v10 = vld [vmem:[%s1561_s20 + $0x8] sm:$0xff] }
 0x359   :  { %646 = vmatpush.bf16.msra.mxu2 %v891_v10 }
 0x35a   :  { %v495_v16 = vand.u32 2147483647, %v491_v15  ;;  %v494_v25 = vmax.f32 %v491_v15, 0.0  ;;  %v735_v33 = vmul.f32 %v470_v27, %v470_v27 }
 0x35c   :  { %v496_v17 = vsub.f32 0.0, %v495_v16 }
 0x35d   :  { %647 = vmatpush.bf16.msra.mxu2 %v890_v11 }
 0x35e   :  { %v497_v18 = vmul.f32 1.442695, %v496_v17 }
 0x35f   :  { %v471_v19 = vpop.f32.mrf.mxu3  ;;  %v492_v20 = vpop.f32.mrf.mxu2 }
 0x360   :  { %939 = vpow2.f32 %v497_v18 }
 0x366   :  { %v940_v21 = vpop.eup %939 }
 0x367   :  { %v499_v22 = vadd.f32 1.0, %v940_v21 }
 0x369   :  { %941 = vlog2.f32 %v499_v22 }
 0x36f   :  { %v942_v24 = vpop.eup %941 }
 0x370   :  { %v501_v26 = vmul.f32 0.6931472, %v942_v24 }
 0x372   :  { %v502_v28 = vadd.f32 %v501_v26, %v494_v25  ;;  %v895_v26 = vld [vmem:[#allocation19 + $0x18] sm:$0xff] }
 0x373   :  { %707 = vmatpush.bf16.msra.mxu0 %v895_v26 }
 0x374   :  { %v503_v30 = vadd.f32 1e-08, %v502_v28  ;;  %v893_v28 = vld [vmem:[#allocation19 + $0x8] sm:$0xff] }
 0x376   :  { %v505_v31 = vmul.f32 %v504_v29, %v503_v30  ;;  %v734_v32 = vmul.f32 %v503_v30, %v503_v30  ;;  %943 = vlog2.f32 %v503_v30  ;;  %v892_v29 = vld [vmem:[#allocation19] sm:$0xff] }
 0x378   :  { %v1500_v34 = vadd.f32 %v505_v31, %v470_v27  ;;  %v736_v35 = vadd.f32 %v735_v33, %v734_v32 }
 0x37a   :  { %v507_v36 = vpack.c.bf16 %v1500_v34, %v1500_v34  ;;  %v877_v37 = vadd.f32 -1.0, %v736_v35 }
 0x37c   :  { %v944_v38 = vpop.eup %943  ;;  %844 = vmatmul.msk.bf16.vlgmr.msrb.gmra.mxu0 %vm452_vm8, %v507_v36  ;;  %v738_v39 = vsel %vm452_vm8, %v877_v37, 0.0 }
 0x37d   :  { %739 = vadd.xlane.f32.xlu0 %v738_v39  ;;  %v743_v40 = vmul.f32 0.6931472, %v944_v38 }
 0x37f   :  { %v744_v41 = vsel %vm452_vm8, %v743_v40, 0.0 }
 0x380   :  { %745 = vadd.xlane.f32.xlu1 %v744_v41 }
 0x391   :  { %749 = vrot.lane.b32.xlu0 %v470_v27, %s1280_s26  ;;  %v894_v27 = vld [vmem:[#allocation19 + $0x10] sm:$0xff] }
 0x392   :  { %708 = vmatpush.bf16.msra.mxu0 %v894_v27 }
 0x396   :  { %709 = vmatpush.bf16.msra.mxu0 %v893_v28 }
 0x399   :  { %753 = vrot.lane.b32.xlu1 %v503_v30, %s1282_s10  ;;  %v921_v30 = vld [vmem:[%s1562_s21] ss:$0 sm:$0xff] }
 0x39a   :  { %710 = vmatpush.bf16.msra.mxu0 %v892_v29 }
 0x3f9   :  { %v528_v45 = vpop.f32.mrf.mxu0 }
 0x3fa   :  { %v529_v46 = vadd.f32 %v918_v44, %v528_v45  ;;  %v922_v45 = vld [vmem:[%s1564_s23] ss:$0 sm:$0xff]  ;;  %s1283_s23 = smov 80  }
 0x3fc   :  { %v532_v47 = vand.u32 2147483647, %v529_v46  ;;  %vm538_vm9 = vcmp.ge.f32.partialorder %v529_v46, 0.0 }
 0x3fe   :  { %v533_v48 = vsub.f32 0.0, %v532_v47 }
 0x400   :  { %v534_v49 = vmul.f32 1.442695, %v533_v48 }
 0x401   :  { %v530_v50 = vpop.f32.mrf.mxu0 }
 0x402   :  { %945 = vpow2.f32 %v534_v49 }
 0x408   :  { %v946_v51 = vpop.eup %945 }
 0x409   :  { %v536_v52 = vadd.f32 1.0, %v946_v51 }
 0x40b   :  { %947 = vrcp.f32 %v536_v52 }
 0x411   :  { %v948_v53 = vpop.eup %947 }
 0x412   :  { %v539_v54 = vmul.f32 %v948_v53, %v946_v51 }
 0x414   :  { %v540_v55 = vsel %vm538_vm9, %v948_v53, %v539_v54 }
 0x415   :  { %v541_v56 = vmul.f32 %v540_v55, %v529_v46 }
 0x417   :  { %v542_v57 = vpack.c.bf16 %v541_v56, %v541_v56 }
 0x419   :  { %845 = vmatmul.msk.bf16.vlgmr.msrb.gmra.mxu1 %vm452_vm8, %v542_v57 }
 0x496   :  { %v563_v60 = vpop.f32.mrf.mxu1 }
 0x497   :  { %v564_v61 = vadd.f32 %v919_v59, %v563_v60 }
 0x499   :  { %v567_v62 = vand.u32 2147483647, %v564_v61  ;;  %vm573_vm10 = vcmp.ge.f32.partialorder %v564_v61, 0.0 }
 0x49b   :  { %v568_v63 = vsub.f32 0.0, %v567_v62 }
 0x49d   :  { %v569_v0 = vmul.f32 1.442695, %v568_v63 }
 0x49e   :  { %v565_v1 = vpop.f32.mrf.mxu1 }
 0x49f   :  { %949 = vpow2.f32 %v569_v0  ;;  %v740_v0 = vpop.xlane.xlu0 %739  ;;  %v746_v1 = vpop.xlane.xlu1 %745 }
 0x4a5   :  { %v950_v2 = vpop.eup %949 }
 0x4a6   :  { %v571_v3 = vadd.f32 1.0, %v950_v2 }
 0x4a8   :  { %951 = vrcp.f32 %v571_v3  ;;  %v750_v3 = vpop.permute.xlu0 %749 }
 0x4ae   :  { %v952_v5 = vpop.eup %951 }
 0x4af   :  { %v574_v6 = vmul.f32 %v952_v5, %v950_v2 }
 0x4b1   :  { %v575_v7 = vsel %vm573_vm10, %v952_v5, %v574_v6  ;;  %v741_v5 = vmul.f32 0.5, %v740_v0 }
 0x4b2   :  { %v576_v8 = vmul.f32 %v575_v7, %v564_v61  ;;  %v754_v7 = vpop.permute.xlu1 %753 }
 0x4b4   :  { %v577_v9 = vpack.c.bf16 %v576_v8, %v576_v8 }
 0x4b6   :  { %850 = vmatmul.msk.bf16.vlgmr.msra.gmra.mxu3 %vm419_vm5, %v577_v9 }
 0x539   :  { %v602_v13 = vpop.f32.mrf.mxu3 }
 0x53a   :  { %v603_v14 = vadd.f32 %v920_v12, %v602_v13 }
 0x53c   :  { %v606_v15 = vand.u32 2147483647, %v603_v14  ;;  %vm612_vm11 = vcmp.ge.f32.partialorder %v603_v14, 0.0 }
 0x53e   :  { %v607_v16 = vsub.f32 0.0, %v606_v15 }
 0x540   :  { %v608_v17 = vmul.f32 1.442695, %v607_v16 }
 0x541   :  { %v604_v18 = vpop.f32.mrf.mxu3 }
 0x542   :  { %953 = vpow2.f32 %v608_v17 }
 0x548   :  { %v954_v19 = vpop.eup %953 }
 0x549   :  { %v610_v20 = vadd.f32 1.0, %v954_v19 }
 0x54b   :  { %955 = vrcp.f32 %v610_v20 }
 0x551   :  { %v956_v21 = vpop.eup %955 }
 0x552   :  { %v613_v22 = vmul.f32 %v956_v21, %v954_v19 }
 0x554   :  { %v614_v23 = vsel %vm612_vm11, %v956_v21, %v613_v22 }
 0x555   :  { %v615_v24 = vmul.f32 %v614_v23, %v603_v14 }
 0x557   :  { %v616_v25 = vpack.c.bf16 %v615_v24, %v615_v24 }
 0x559   :  { %859 = vmatmul.msk.bf16.vlgmr.msra.gmra.mxu2 %vm379_vm3, %v616_v25  ;;  %vm769_vm3 = vcmask 736256  }
 0x5dc   :  { %v649_v31 = vpop.f32.mrf.mxu2 }
 0x5dd   :  { %v650_v32 = vadd.f32 %v921_v30, %v649_v31 }
 0x5df   :  { %v653_v33 = vand.u32 2147483647, %v650_v32  ;;  %vm659_vm12 = vcmp.ge.f32.partialorder %v650_v32, 0.0 }
 0x5e1   :  { %v654_v35 = vsub.f32 0.0, %v653_v33 }
 0x5e3   :  { %v655_v36 = vmul.f32 1.442695, %v654_v35 }
 0x5e4   :  { %v651_v37 = vpop.f32.mrf.mxu2 }
 0x5e5   :  { %957 = vpow2.f32 %v655_v36 }
 0x5eb   :  { %v958_v38 = vpop.eup %957 }
 0x5ec   :  { %v657_v39 = vadd.f32 1.0, %v958_v38 }
 0x5ee   :  { %959 = vrcp.f32 %v657_v39 }
 0x5f4   :  { %v960_v40 = vpop.eup %959 }
 0x5f5   :  { %v660_v41 = vmul.f32 %v960_v40, %v958_v38 }
 0x5f7   :  { %v661_v42 = vsel %vm659_vm12, %v960_v40, %v660_v41 }
 0x5f8   :  { %v662_v43 = vmul.f32 %v661_v42, %v650_v32 }
 0x5fa   :  { %v663_v44 = vpack.c.bf16 %v662_v43, %v662_v43 }
 0x5fc   :  { %876 = vmatmul.msk.bf16.vlgmr.msra.gmra.mxu0 %vm268_vm0, %v663_v44 }
 0x679   :  { %v712_v46 = vpop.f32.mrf.mxu0 }
 0x67a   :  { %v713_v47 = vadd.f32 %v922_v45, %v712_v46 }
 0x67c   :  { %v716_v48 = vand.u32 2147483647, %v713_v47  ;;  %v725_v56 = vmax.f32 %v713_v47, 0.0  ;;  %vm722_vm13 = vcmp.ge.f32.partialorder %v713_v47, 0.0  ;;  %v729_v60 = vmul.f32 %v713_v47, %v1460_v4 }
 0x67e   :  { %v717_v49 = vsub.f32 0.0, %v716_v48 }
 0x680   :  { %v718_v50 = vmul.f32 1.442695, %v717_v49 }
 0x681   :  { %v714_v51 = vpop.f32.mrf.mxu0 }
 0x682   :  { %961 = vpow2.f32 %v718_v50 }
 0x688   :  { %v962_v52 = vpop.eup %961 }
 0x689   :  { %v720_v53 = vadd.f32 1.0, %v962_v52 }
 0x68b   :  { %963 = vlog2.f32 %v720_v53 }
 0x68c   :  { %965 = vrcp.f32 %v720_v53 }
 0x691   :  { %v964_v54 = vpop.eup %963 }
 0x692   :  { %v966_v55 = vpop.eup %965  ;;  %v727_v57 = vmul.f32 0.6931472, %v964_v54 }
 0x693   :  { %v723_v58 = vmul.f32 %v966_v55, %v962_v52 }
 0x694   :  { %v728_v59 = vadd.f32 %v727_v57, %v725_v56 }
 0x695   :  { %v724_v61 = vsel %vm722_vm13, %v966_v55, %v723_v58 }
 0x696   :  { %v730_v62 = vsub.f32 %v728_v59, %v729_v60  ;;  %v760_v6 = vsel %vm268_vm0, %v724_v61, %v750_v3 }
 0x697   :  { %v762_v8 = vsel %vm761_vm14, %v760_v6, %v754_v7 }
 0x698   :  { %v731_v63 = vsel %vm268_vm0, %v730_v62, 0.0 }
 0x699   :  { %732 = vadd.xlane.f32.xlu2 %v731_v63 }
 0x6b1   :  { %757 = vrot.lane.b32.xlu2 %v1500_v34, %s1283_s23  ;;  %v747_v34 = vsub.f32 %v741_v5, %v746_v1 }
 0x70c   :  { %v733_v2 = vpop.xlane.xlu2 %732 }
 0x714   :  { %v758_v4 = vpop.permute.xlu2 %757 }
 0x715   :  { %v764_v9 = vsel %vm763_vm15, %v762_v8, %v758_v4 }
 0x716   :  { %v766_v10 = vsel %vm765_vm1, %v764_v9, %v733_v2 }
 0x717   :  { %v768_v11 = vsel %vm767_vm2, %v766_v10, %v747_v34 }
 0x718   :  { %v770_v12 = vsel %vm769_vm3, %v768_v11, 0.0 }
 0x719   :  { %771 = vst [vmem:[#allocation20] sm:$0xff] %v770_v12 }
 0x71a   :  { %782 = dma.vmem_to_hbm [thread:$0]  %s778_s9, 128, %s780_s28, [#allocation4]  }
 0x71b   :  { %1267 = dma.done.wait [#allocation4], 128  }
 0x71c   :  { %1268 = vsyncadd [#allocation4], 4294967168 }
 0x71d   :  { %787 = vsyncpa [#allocation3], 1 }
 0x71e   :  { %788 = vsyncpa [#allocation6], 1 }
 0x71f   :  { %789 = vsyncpa [#allocation9], 1 }
 0x720   :  { %790 = vsyncpa [#allocation12], 1 }
 0x721   :  { %791 = vsyncpa [#allocation15], 1 }
 0x722   :  { %792 = vsyncpa [#allocation18], 1 }
 0x723   :  { %793 = vsyncpa [#allocation4], 1 }

</bundles_post_ra>
